<compile_context>
chip_gen: v5e
topology: v5e:2x2
jax: 0.10.0
libtpu: 0.0.40
codegen_flags: <defaults>
</compile_context>

<pallas_src>
import functools

import jax
import jax.numpy as jnp
from jax.experimental import pallas as pl
from jax.experimental.pallas import tpu as pltpu


def _round_up(x, m):
    return ((x + m - 1) // m) * m


def _pad_dim4(dim4):
    """Lane-dense output padding only when it is nearly free."""
    dim4_p = _round_up(dim4, 128)
    if dim4 >= 128 and (dim4_p - dim4) * 8 <= dim4:
        return dim4_p
    return dim4


def merge_layer_kernel(x1_ref, x2_ref, w1a_ref, w1b_ref, b1_ref,
                       w2_ref, b2_ref, o_ref):
    cdt = w1a_ref.dtype
    # fc1 on the concatenated input, expressed as two matmuls (fused concat).
    # Activations are cast to the MXU compute dtype here (VPU cast, hidden
    # under DMA); accumulation / bias / ReLU stay f32.
    h = (jnp.dot(x1_ref[...].astype(cdt), w1a_ref[...],
                 preferred_element_type=jnp.float32)
         + jnp.dot(x2_ref[...].astype(cdt), w1b_ref[...],
                   preferred_element_type=jnp.float32)
         + b1_ref[...])
    h = jnp.maximum(h, 0.0)                      # ReLU (f32 VPU)
    # fc2 -- cast h to the weight compute dtype so the MXU sees matching inputs.
    y = (jnp.dot(h.astype(w2_ref.dtype), w2_ref[...],
                 preferred_element_type=jnp.float32)
         + b2_ref[...])
    o_ref[...] = y.astype(o_ref.dtype)


def prepare_params(w1, b1, w2, b2, dim1, dim2=None, *, compute_dtype=jnp.bfloat16):
    """One-time weight preprocessing (hoisted out of the per-call path).

    w1: [dim3, dim1+dim2] (torch layout), b1: [dim3],
    w2: [dim4, dim3],      b2: [dim4].
    Returns kernel-ready arrays:
      w1a [dim1, dim3], w1b [dim2, dim3]   (compute_dtype)
      b1  [1, dim3]                         (f32)
      w2  [dim3, dim4_p]                    (compute_dtype; padded only if cheap)
      b2  [1, dim4_p]                       (f32)
    """
    dim3, din = w1.shape
    if dim2 is None:
        dim2 = din - dim1
    assert 0 < dim1 < din and dim1 + dim2 == din, \
        f"split mismatch: dim1={dim1}, dim2={dim2}, w1 in-features={din}"
    dim4 = w2.shape[0]
    dim4_p = _pad_dim4(dim4)

    w1t = w1.T.astype(compute_dtype)          # [dim1+dim2, dim3]
    w1a = w1t[:dim1, :]                       # [dim1, dim3]
    w1b = w1t[dim1:, :]                       # [dim2, dim3]

    b1r = b1.reshape(1, dim3).astype(jnp.float32)

    if dim4_p == dim4:
        w2p = w2.T.astype(compute_dtype)                      # [dim3, dim4]
        b2p = b2.reshape(1, dim4).astype(jnp.float32)
    else:
        w2p = jnp.zeros((dim3, dim4_p), compute_dtype)
        w2p = w2p.at[:, :dim4].set(w2.T.astype(compute_dtype))
        b2p = jnp.zeros((1, dim4_p), jnp.float32)
        b2p = b2p.at[0, :dim4].set(b2.astype(jnp.float32))

    return {"w1a": w1a, "w1b": w1b, "b1": b1r, "w2": w2p, "b2": b2p,
            "dim4": dim4}


@functools.partial(jax.jit, static_argnames=("block_b",))
def _merge_layer_impl(x1, x2, w1a, w1b, b1, w2, b2, *, block_b):
    B, dim1 = x1.shape
    _, dim2 = x2.shape
    dim3, dim4_p = w2.shape
    in_bytes = jnp.dtype(x1.dtype).itemsize
    c_bytes = jnp.dtype(w1a.dtype).itemsize

    grid = (pl.cdiv(B, block_b),)             # ragged B handled by Pallas masking

    # Explicit VMEM budget: double-buffered x1/x2/out tiles, resident
    # weights/biases (2 bufs each -- tiny), plus in-kernel intermediates
    # (x casts, h in f32 + its cast, f32 result tile).  2x margin.
    est = (2 * block_b * (dim1 + dim2) * in_bytes                 # x1/x2 tiles
           + 2 * block_b * dim4_p * 4                             # out tiles
           + 2 * ((dim1 + dim2) * dim3 + dim3 * dim4_p) * c_bytes # weights
           + 2 * (dim3 + dim4_p) * 4                              # biases
           + block_b * (dim1 + dim2) * c_bytes                    # x casts
           + block_b * dim3 * (4 + c_bytes)                       # h + h cast
           + block_b * dim4_p * 4)                                # y
    vmem_limit = int(min(48 << 20, max(16 << 20, 2 * est + (1 << 20))))

    return pl.pallas_call(
        merge_layer_kernel,
        out_shape=jax.ShapeDtypeStruct((B, dim4_p), jnp.float32),
        grid_spec=pltpu.PrefetchScalarGridSpec(
            num_scalar_prefetch=0,
            grid=grid,
            in_specs=[
                pl.BlockSpec((block_b, dim1), lambda i: (i, 0)),   # x1 tile
                pl.BlockSpec((block_b, dim2), lambda i: (i, 0)),   # x2 tile
                pl.BlockSpec((dim1, dim3), lambda i: (0, 0)),      # W1a (resident)
                pl.BlockSpec((dim2, dim3), lambda i: (0, 0)),      # W1b (resident)
                pl.BlockSpec((1, dim3), lambda i: (0, 0)),         # b1
                pl.BlockSpec((dim3, dim4_p), lambda i: (0, 0)),    # W2 (resident)
                pl.BlockSpec((1, dim4_p), lambda i: (0, 0)),       # b2
            ],
            out_specs=pl.BlockSpec((block_b, dim4_p), lambda i: (i, 0)),
        ),
        compiler_params=pltpu.CompilerParams(
            dimension_semantics=("parallel",),      # v7x shards batch axis across TCs
            vmem_limit_bytes=vmem_limit),
    )(x1, x2, w1a, w1b, b1, w2, b2)


def merge_layer(x1, x2, params, *, block_b=None):
    """x1: [B, dim1], x2: [B, dim2], params from prepare_params().
    Returns [B, dim4] float32."""
    B = x1.shape[0]
    dim4 = params["dim4"]
    dim4_p = params["w2"].shape[1]

    if block_b is None:
        if B <= 16:
            block_b = _round_up(max(B, 1), 8)            # single grid step
        else:
            # >= 2 grid steps so both v7x TensorCores engage; 16-row alignment
            # (bf16-safe); cap at 1024 rows (per-row VMEM ~1 KiB) for v6e.
            block_b = min(1024, _round_up(pl.cdiv(B, 2), 16))
    else:
        block_b = _round_up(max(int(block_b), 8), 8)     # defensive (8,128) guard

    out = _merge_layer_impl(x1, x2,
                            params["w1a"], params["w1b"], params["b1"],
                            params["w2"], params["b2"],
                            block_b=block_b)
    if dim4_p != dim4:
        out = out[:, :dim4]                  # only when lane-dense padding was used
    return out


def init_params(key, dim1, dim2, dim3, dim4, dtype=jnp.float32):
    """Deterministic init mirroring the PyTorch module shapes.
    fc weights: xavier_normal_, biases: torch default U(-1/sqrt(fan_in), 1/sqrt(fan_in))."""
    k1, k2, k3, k4 = jax.random.split(key, 4)
    fan_in1, fan_out1 = dim1 + dim2, dim3
    std1 = (2.0 / (fan_in1 + fan_out1)) ** 0.5
    w1 = std1 * jax.random.normal(k1, (dim3, dim1 + dim2), dtype)   # torch [out, in]
    b1 = jax.random.uniform(k2, (dim3,), dtype,
                            -1.0 / fan_in1 ** 0.5, 1.0 / fan_in1 ** 0.5)
    fan_in2, fan_out2 = dim3, dim4
    std2 = (2.0 / (fan_in2 + fan_out2)) ** 0.5
    w2 = std2 * jax.random.normal(k3, (dim4, dim3), dtype)
    b2 = jax.random.uniform(k4, (dim4,), dtype,
                            -1.0 / fan_in2 ** 0.5, 1.0 / fan_in2 ** 0.5)
    return w1, b1, w2, b2


def reference(x1, x2, w1, b1, w2, b2):
    x = jnp.concatenate([x1, x2], axis=1)
    h = jnp.maximum(x @ w1.T + b1, 0.0)
    return h @ w2.T + b2


if __name__ == "__main__":
    B, dim1, dim2, dim3, dim4 = 16, 32, 32, 64, 16
    key = jax.random.PRNGKey(0)
    kx1, kx2, kx3, kx4, kp = jax.random.split(key, 5)
    x1 = jax.random.normal(kx1, (B, dim1), jnp.float32)
    x2 = jax.random.normal(kx2, (B, dim2), jnp.float32)
    w1, b1, w2, b2 = init_params(kp, dim1, dim2, dim3, dim4)
    ref = reference(x1, x2, w1, b1, w2, b2)

    # 1) f32 compute path: tight tolerance check.
    params_f32 = prepare_params(w1, b1, w2, b2, dim1, dim2, compute_dtype=jnp.float32)
    out_f32 = jax.block_until_ready(merge_layer(x1, x2, params_f32))
    assert out_f32.shape == (B, dim4)
    assert jnp.allclose(out_f32, ref, atol=1e-5, rtol=1e-5), "f32 mismatch vs reference"

    # 2) bf16 MXU path (v6e/v7x recommended): loose tolerance check.
    params_bf16 = prepare_params(w1, b1, w2, b2, dim1, dim2, compute_dtype=jnp.bfloat16)
    out_bf16 = jax.block_until_ready(merge_layer(x1, x2, params_bf16))
    assert out_bf16.shape == (B, dim4)
    assert jnp.allclose(out_bf16, ref, atol=5e-2, rtol=5e-2), "bf16 mismatch vs reference"

    # 3) ragged batch: single partial block, handled by Pallas masking (no jnp.pad).
    Br = 13
    out_rag = jax.block_until_ready(merge_layer(x1[:Br], x2[:Br], params_f32))
    assert out_rag.shape == (Br, dim4)
    assert jnp.allclose(out_rag, ref[:Br], atol=1e-5, rtol=1e-5), "ragged mismatch"

    # 4) multi-step grid (>= 2 TC-shardable steps) with a partial last block.
    Bm = 40
    x1m = jax.random.normal(kx3, (Bm, dim1), jnp.float32)
    x2m = jax.random.normal(kx4, (Bm, dim2), jnp.float32)
    refm = reference(x1m, x2m, w1, b1, w2, b2)
    out_m = jax.block_until_ready(merge_layer(x1m, x2m, params_f32))
    assert out_m.shape == (Bm, dim4)
    assert jnp.allclose(out_m, refm, atol=1e-5, rtol=1e-5), "multi-step grid mismatch"

    print("KERNEL_OK")
</pallas_src>

<mosaic_0001>
module attributes {stable_mosaic.version = 11 : i64} {
  func.func @merge_layer_kernel(%arg0: i32, %arg1: memref<16x32xf32, #tpu.memory_space<vmem>>, %arg2: memref<16x32xf32, #tpu.memory_space<vmem>>, %arg3: memref<32x64xf32, #tpu.memory_space<vmem>>, %arg4: memref<32x64xf32, #tpu.memory_space<vmem>>, %arg5: memref<1x64xf32, #tpu.memory_space<vmem>>, %arg6: memref<64x16xf32, #tpu.memory_space<vmem>>, %arg7: memref<1x16xf32, #tpu.memory_space<vmem>>, %arg8: memref<16x16xf32, #tpu.memory_space<vmem>>) attributes {dimension_semantics = [#tpu.dimension_semantics<parallel>], iteration_bounds = array<i64: 1>, scalar_prefetch = 0 : i64, scratch_operands = 0 : i64, tpu.core_type = #tpu.core_type<tc>, window_params = [{transform_indices = @transform_0, window_bounds = array<i64: 16, 32>}, {transform_indices = @transform_1, window_bounds = array<i64: 16, 32>}, {pipeline_mode = #tpu.pipeline_mode<synchronous>, transform_indices = @transform_2, window_bounds = array<i64: 32, 64>}, {pipeline_mode = #tpu.pipeline_mode<synchronous>, transform_indices = @transform_3, window_bounds = array<i64: 32, 64>}, {pipeline_mode = #tpu.pipeline_mode<synchronous>, transform_indices = @transform_4, window_bounds = array<i64: 1, 64>}, {pipeline_mode = #tpu.pipeline_mode<synchronous>, transform_indices = @transform_5, window_bounds = array<i64: 64, 16>}, {pipeline_mode = #tpu.pipeline_mode<synchronous>, transform_indices = @transform_6, window_bounds = array<i64: 1, 16>}, {transform_indices = @transform_7, window_bounds = array<i64: 16, 16>}]} {
    %c0 = arith.constant 0 : index
    %c0_0 = arith.constant 0 : index
    %0 = vector.load %arg1[%c0, %c0_0] : memref<16x32xf32, #tpu.memory_space<vmem>>, vector<16x32xf32>
    %c0_1 = arith.constant 0 : index
    %c0_2 = arith.constant 0 : index
    %1 = vector.load %arg3[%c0_1, %c0_2] : memref<32x64xf32, #tpu.memory_space<vmem>>, vector<32x64xf32>
    %cst = arith.constant dense<0.000000e+00> : vector<16x64xf32>
    %2 = tpu.matmul %0, %1, %cst {dimension_numbers = #tpu.dot_dimension_numbers<[1], [0], [0], [1], [0, 0, 1, 1], [], []>} : vector<16x32xf32>, vector<32x64xf32>, vector<16x64xf32> -> vector<16x64xf32>
    %c0_3 = arith.constant 0 : index
    %c0_4 = arith.constant 0 : index
    %3 = vector.load %arg2[%c0_3, %c0_4] : memref<16x32xf32, #tpu.memory_space<vmem>>, vector<16x32xf32>
    %c0_5 = arith.constant 0 : index
    %c0_6 = arith.constant 0 : index
    %4 = vector.load %arg4[%c0_5, %c0_6] : memref<32x64xf32, #tpu.memory_space<vmem>>, vector<32x64xf32>
    %cst_7 = arith.constant dense<0.000000e+00> : vector<16x64xf32>
    %5 = tpu.matmul %3, %4, %cst_7 {dimension_numbers = #tpu.dot_dimension_numbers<[1], [0], [0], [1], [0, 0, 1, 1], [], []>} : vector<16x32xf32>, vector<32x64xf32>, vector<16x64xf32> -> vector<16x64xf32>
    %6 = arith.addf %2, %5 : vector<16x64xf32>
    %c0_8 = arith.constant 0 : index
    %c0_9 = arith.constant 0 : index
    %7 = vector.load %arg5[%c0_8, %c0_9] : memref<1x64xf32, #tpu.memory_space<vmem>>, vector<1x64xf32>
    %8 = vector.broadcast %7 : vector<1x64xf32> to vector<16x64xf32>
    %9 = arith.addf %6, %8 : vector<16x64xf32>
    %cst_10 = arith.constant 0.000000e+00 : f32
    %10 = vector.broadcast %cst_10 : f32 to vector<16x64xf32>
    %11 = arith.maximumf %9, %10 : vector<16x64xf32>
    %c0_11 = arith.constant 0 : index
    %c0_12 = arith.constant 0 : index
    %12 = vector.load %arg6[%c0_11, %c0_12] : memref<64x16xf32, #tpu.memory_space<vmem>>, vector<64x16xf32>
    %cst_13 = arith.constant dense<0.000000e+00> : vector<16x16xf32>
    %13 = tpu.matmul %11, %12, %cst_13 {dimension_numbers = #tpu.dot_dimension_numbers<[1], [0], [0], [1], [0, 0, 1, 1], [], []>} : vector<16x64xf32>, vector<64x16xf32>, vector<16x16xf32> -> vector<16x16xf32>
    %c0_14 = arith.constant 0 : index
    %c0_15 = arith.constant 0 : index
    %14 = vector.load %arg7[%c0_14, %c0_15] : memref<1x16xf32, #tpu.memory_space<vmem>>, vector<1x16xf32>
    %15 = vector.broadcast %14 : vector<1x16xf32> to vector<16x16xf32>
    %16 = arith.addf %13, %15 : vector<16x16xf32>
    %c0_16 = arith.constant 0 : index
    %c0_17 = arith.constant 0 : index
    %17 = vector.load %arg8[%c0_16, %c0_17] : memref<16x16xf32, #tpu.memory_space<vmem>>, vector<16x16xf32>
    tpu.vector_store %arg8[%c0_16, %c0_17], %16 {strides = array<i32>} : memref<16x16xf32, #tpu.memory_space<vmem>>, vector<16x16xf32>,
    return
  }
  func.func @transform_0(%arg0: i32) -> (i32, i32) {
    %c0_i32 = arith.constant 0 : i32
    %c0_i32_0 = arith.constant 0 : i32
    return %arg0, %c0_i32 : i32, i32
  }
  func.func @transform_1(%arg0: i32) -> (i32, i32) {
    %c0_i32 = arith.constant 0 : i32
    %c0_i32_0 = arith.constant 0 : i32
    return %arg0, %c0_i32 : i32, i32
  }
  func.func @transform_2(%arg0: i32) -> (i32, i32) {
    %c0_i32 = arith.constant 0 : i32
    %c0_i32_0 = arith.constant 0 : i32
    %c0_i32_1 = arith.constant 0 : i32
    return %c0_i32, %c0_i32_0 : i32, i32
  }
  func.func @transform_3(%arg0: i32) -> (i32, i32) {
    %c0_i32 = arith.constant 0 : i32
    %c0_i32_0 = arith.constant 0 : i32
    %c0_i32_1 = arith.constant 0 : i32
    return %c0_i32, %c0_i32_0 : i32, i32
  }
  func.func @transform_4(%arg0: i32) -> (i32, i32) {
    %c0_i32 = arith.constant 0 : i32
    %c0_i32_0 = arith.constant 0 : i32
    %c0_i32_1 = arith.constant 0 : i32
    return %c0_i32, %c0_i32_0 : i32, i32
  }
  func.func @transform_5(%arg0: i32) -> (i32, i32) {
    %c0_i32 = arith.constant 0 : i32
    %c0_i32_0 = arith.constant 0 : i32
    %c0_i32_1 = arith.constant 0 : i32
    return %c0_i32, %c0_i32_0 : i32, i32
  }
  func.func @transform_6(%arg0: i32) -> (i32, i32) {
    %c0_i32 = arith.constant 0 : i32
    %c0_i32_0 = arith.constant 0 : i32
    %c0_i32_1 = arith.constant 0 : i32
    return %c0_i32, %c0_i32_0 : i32, i32
  }
  func.func @transform_7(%arg0: i32) -> (i32, i32) {
    %c0_i32 = arith.constant 0 : i32
    %c0_i32_0 = arith.constant 0 : i32
    return %arg0, %c0_i32 : i32, i32
  }
}

</mosaic_0001>

<bundles_post_ra>
// kernel: _merge_layer_impl.1
= control target key start
LH: loop header
LB: loop body
LE: loop exit
PB: predicated region body
PF: predicated region fallthrough
CT: control target
= control target key end

     0   :  { %12 = vsyncpa [#allocation3], 0  ;;  %s378_s0 = inlined_call_operand.vmem [shape: f32[16,32], index: 0, kind: input, shape index: {}]   ;;  %s379_s1 = inlined_call_operand.hbm [shape: f32[16,32], index: 1, kind: input, shape index: {}]   ;;  %s380_s2 = inlined_call_operand.vmem [shape: f32[32,64], index: 2, kind: input, shape index: {}]   ;;  %s381_s3 = inlined_call_operand.vmem [shape: f32[32,64], index: 3, kind: input, shape index: {}]   ;;  %s382_s4 = inlined_call_operand.vmem [shape: f32[1,64], index: 4, kind: input, shape index: {}]   ;;  %s383_s5 = inlined_call_operand.vmem [shape: f32[64,16], index: 5, kind: input, shape index: {}]   ;;  %s384_s6 = inlined_call_operand.vmem [shape: f32[1,16], index: 6, kind: input, shape index: {}]   ;;  %s385_s7 = inlined_call_operand.hbm [shape: f32[16,16], index: 7, kind: output, shape index: {}]  }
   0x1   :  { %13 = vsyncpa [#allocation4], 0  ;;  %s20_s26 = sshll.u32 %s379_s1, 4  ;;  %s258_s27 = smov [#allocation2]   ;;  %s21_s26 = int_to_ptr.hbm [resolvable:$true] %s20_s26 }
   0x2   :  { %s22_s28 = sshll.u32 %s258_s27, 4  ;;  %s259_s29 = smov 128   ;;  %s23_s28 = int_to_ptr.vmem [resolvable:$true] %s22_s28 }
   0x3   :  { %s260_s30 = smov 8  }
   0x4   :  { %28 = dma.hbm_to_vmem [thread:$0]  %s21_s26, 256, %s23_s28, [#allocation3], %s259_s29, %s259_s29, %s260_s30  }
   0x5   :  { %254 = dma.done.wait [#allocation3], 256  }
   0x6   :  { %255 = vsyncadd [#allocation3], 4294967040  ;;  %v54_v0 = vld [vmem:[%s381_s3 + $0x18] sm:$0xff]  ;;  %v53_v2 = vld [vmem:[%s381_s3 + $0x10] sm:$0xff]  ;;  %vm55_vm0 = vcmask 261120   ;;  %vm134_vm1 = vcmask 523264  }
   0x7   :  { %v48_v1 = vld [vmem:[%s380_s2 + $0x18] sm:$0xff]  ;;  %74 = vmatpush.msra.mxu0 %v54_v0  ;;  %v47_v3 = vld [vmem:[%s380_s2 + $0x10] sm:$0xff]  ;;  %v52_v4 = vld [vmem:[%s381_s3 + $0x8] sm:$0xff]  ;;  %vm164_vm2 = vcmask 130048   ;;  %s173_s24 = sshll.u32 %s385_s7, 4  ;;  %s174_s24 = int_to_ptr.hbm [resolvable:$true] %s173_s24 }
   0x8   :  { %103 = vmatpush.msra.mxu1 %v48_v1  ;;  %v46_v5 = vld [vmem:[%s380_s2 + $0x8] sm:$0xff]  ;;  %v51_v6 = vld [vmem:[%s381_s3] sm:$0xff]  ;;  %v129_v9 = vld [vmem:[%s383_s5 + $0x38] sm:$0xff] }
   0x9   :  { %75 = vmatpush.msra.mxu0 %v53_v2  ;;  %v45_v7 = vld [vmem:[%s380_s2] sm:$0xff]  ;;  %149 = vmatpush.msra.mxu2 %v129_v9  ;;  %v128_v11 = vld [vmem:[%s383_s5 + $0x30] sm:$0xff]  ;;  %v127_v12 = vld [vmem:[%s383_s5 + $0x28] sm:$0xff] }
   0xa   :  { %104 = vmatpush.msra.mxu1 %v47_v3  ;;  %v49_v8 = vld [vmem:[#allocation2] sm:$0xff]  ;;  %192 = vmatpush.msra.mxu3 %v129_v9  ;;  %v50_v14 = vld [vmem:[#allocation2 + $0x8] sm:$0xff]  ;;  %v125_v16 = vld [vmem:[%s383_s5 + $0x18] sm:$0xff] }
   0xb   :  { %76 = vmatpush.msra.mxu0 %v52_v4  ;;  %v43_v10 = vld [vmem:[%s378_s0] sm:$0xff]  ;;  %150 = vmatpush.msra.mxu2 %v128_v11  ;;  %v44_v15 = vld [vmem:[%s378_s0 + $0x8] sm:$0xff]  ;;  %v124_v17 = vld [vmem:[%s383_s5 + $0x10] sm:$0xff] }
   0xc   :  { %105 = vmatpush.msra.mxu1 %v46_v5  ;;  %193 = vmatpush.msra.mxu3 %v128_v11  ;;  %v126_v13 = vld [vmem:[%s383_s5 + $0x20] sm:$0xff]  ;;  %v123_v18 = vld [vmem:[%s383_s5 + $0x8] sm:$0xff] }
   0xd   :  { %77 = vmatpush.msra.mxu0 %v51_v6  ;;  %151 = vmatpush.msra.mxu2 %v127_v12  ;;  %v122_v19 = vld [vmem:[%s383_s5] sm:$0xff] }
   0xe   :  { %106 = vmatpush.msra.mxu1 %v45_v7  ;;  %186 = vmatmul.msk.f32.vlgmr.msra.gmra.mxu0 %vm55_vm0, %v49_v8  ;;  %v204_v20 = vld [vmem:[%s382_s4] ss:$0 sm:$0xff]  ;;  %s261_s4 = smov [#allocation5]  }
   0xf   :  { %188 = vmatmul.msk.f32.vlgmr.msra.gmra.mxu1 %vm55_vm0, %v43_v10  ;;  %194 = vmatpush.msra.mxu3 %v127_v12  ;;  %v205_v31 = vld [vmem:[%s384_s6] ss:$0 sm:$0xff]  ;;  %s171_s21 = sshll.u32 %s261_s4, 4  ;;  %s172_s21 = int_to_ptr.vmem [resolvable:$true] %s171_s21 }
  0x10   :  { %152 = vmatpush.msra.mxu2 %v126_v13 }
  0x11   :  { %195 = vmatpush.msra.mxu3 %v126_v13 }
  0x12   :  { %153 = vmatpush.msra.mxu2 %v125_v16 }
  0x13   :  { %196 = vmatpush.msra.mxu3 %v125_v16 }
  0x14   :  { %154 = vmatpush.msra.mxu2 %v124_v17 }
  0x15   :  { %197 = vmatpush.msra.mxu3 %v124_v17 }
  0x16   :  { %187 = vmatmul.msk.f32.gmra.mxu0 %vm55_vm0, %v50_v14  ;;  %155 = vmatpush.msra.mxu2 %v123_v18 }
  0x17   :  { %189 = vmatmul.msk.f32.gmra.mxu1 %vm55_vm0, %v44_v15  ;;  %198 = vmatpush.msra.mxu3 %v123_v18 }
  0x18   :  { %156 = vmatpush.msra.mxu2 %v122_v19 }
  0x19   :  { %199 = vmatpush.msra.mxu3 %v122_v19 }
  0x8b   :  { %v79_v21 = vpop.f32.mrf.mxu0 }
  0x8c   :  { %v108_v22 = vpop.f32.mrf.mxu1 }
  0x8d   :  { %v109_v23 = vadd.f32 %v108_v22, %v79_v21 }
  0x8f   :  { %v118_v24 = vadd.f32 %v204_v20, %v109_v23 }
  0x91   :  { %v120_v25 = vmax.f32 %v118_v24, 0.0 }
  0x93   :  { %190 = vmatmul.msk.f32.vlgmr.msra.gmra.mxu2 %vm134_vm1, %v120_v25  ;;  %v82_v26 = vpop.f32.mrf.mxu0 }
  0x94   :  { %v111_v27 = vpop.f32.mrf.mxu1 }
  0x95   :  { %v112_v28 = vadd.f32 %v111_v27, %v82_v26 }
  0x97   :  { %v119_v29 = vadd.f32 %v204_v20, %v112_v28 }
  0x99   :  { %v121_v30 = vmax.f32 %v119_v29, 0.0 }
  0x9b   :  { %191 = vmatmul.msk.f32.vlgmr.msra.gmra.mxu3 %vm134_vm1, %v121_v30 }
 0x116   :  { %v158_v32 = vpop.f32.mrf.mxu2 }
 0x117   :  { %v159_v33 = vadd.f32 %v205_v31, %v158_v32 }
 0x119   :  { %165 = vst.msk [vmem:[#allocation5] sm:$0xff] %vm164_vm2, %v159_v33 }
 0x11e   :  { %v161_v34 = vpop.f32.mrf.mxu3 }
 0x11f   :  { %v162_v35 = vadd.f32 %v205_v31, %v161_v34 }
 0x121   :  { %166 = vst.msk [vmem:[#allocation5 + $0x8] sm:$0xff] %vm164_vm2, %v162_v35 }
 0x122   :  { %179 = dma.vmem_to_hbm [thread:$0]  %s172_s21, 256, %s174_s24, [#allocation4], %s259_s29, %s259_s29, %s260_s30  }
 0x123   :  { %256 = dma.done.wait [#allocation4], 256  }
 0x124   :  { %257 = vsyncadd [#allocation4], 4294967040 }
 0x125   :  { %184 = vsyncpa [#allocation3], 1 }
 0x126   :  { %185 = vsyncpa [#allocation4], 1 }

</bundles_post_ra>
